<compile_context>
chip_gen: v7x
topology: tpu7x:2x2x1
jax: 0.10.0
libtpu: 0.0.40
codegen_flags: <defaults>
</compile_context>

<pallas_src>
import functools

import jax
import jax.numpy as jnp
from jax import lax
from jax.experimental import pallas as pl
from jax.experimental.pallas import tpu as pltpu

EPS = 1e-5                      # nn.BatchNorm2d default eps
LANE = 128
VMEM_LIMIT = 32 * 1024 * 1024   # safe on v5e (raises 16MiB default) and v7x


def _round_up(x, m):
  return (x + m - 1) // m * m


def _choose_tk(k_pad):
  for cand in (512, 384, 256, 128):
    if k_pad % cand == 0:
      return cand
  return 128


def _choose_tm(m):
  # biggest row tile that fits comfortably in VMEM (incl. double buffering),
  # capped so (tm, C_pad<=512) f32 tiles stay well under v7x's 32 MiB scoped.
  return min(512, _round_up(m, 128))


# --------------------------------------------------------------------------
# Kernel 1: conv-as-matmul with K-axis accumulation + per-tile BN partials.
# --------------------------------------------------------------------------
def _conv_stats_kernel(p_ref, w_ref, z_ref, s_ref, sq_ref, acc_ref):
  k = pl.program_id(1)

  @pl.when(k == 0)
  def _():
    acc_ref[...] = jnp.zeros_like(acc_ref)

  acc_ref[...] += jnp.dot(p_ref[...], w_ref[...],
                          preferred_element_type=jnp.float32)

  @pl.when(k == pl.num_programs(1) - 1)
  def _():
    acc = acc_ref[...]
    z_ref[...] = acc
    # per-channel partial sums for this M tile (replicated over 8 sublanes so
    # the output block stays (8,128)-aligned); global mean/var is reduced in
    # plain JAX from these tiny partials -> BN stays globally correct.
    s_ref[...] = jnp.broadcast_to(jnp.sum(acc, axis=0, keepdims=True),
                                  s_ref.shape)
    sq_ref[...] = jnp.broadcast_to(jnp.sum(acc * acc, axis=0, keepdims=True),
                                   sq_ref.shape)


def _conv_matmul_stats(patches, w_mat):
  """patches (M, K), w_mat (K, Cout) -> z (M_pad, C_pad) f32, per-channel
  sum / sumsq over the true M rows, plus tiling metadata."""
  m, k = patches.shape
  cout = w_mat.shape[1]
  c_pad = _round_up(cout, LANE)
  k_pad = _round_up(k, LANE)
  tm = _choose_tm(m)
  m_pad = _round_up(m, tm)
  tk = _choose_tk(k_pad)
  nm, nk = m_pad // tm, k_pad // tk

  # bf16 operands (MXU native), zero padding does not change the result.
  p = jnp.pad(patches.astype(jnp.bfloat16), ((0, m_pad - m), (0, k_pad - k)))
  w = jnp.pad(w_mat.astype(jnp.bfloat16), ((0, k_pad - k), (0, c_pad - cout)))

  z, psum, psq = pl.pallas_call(
      _conv_stats_kernel,
      out_shape=(jax.ShapeDtypeStruct((m_pad, c_pad), jnp.float32),
                 jax.ShapeDtypeStruct((nm * 8, c_pad), jnp.float32),
                 jax.ShapeDtypeStruct((nm * 8, c_pad), jnp.float32)),
      grid=(nm, nk),
      in_specs=[pl.BlockSpec((tm, tk), lambda i, kk: (i, kk)),
                pl.BlockSpec((tk, c_pad), lambda i, kk: (kk, 0))],
      out_specs=(pl.BlockSpec((tm, c_pad), lambda i, kk: (i, 0)),
                 pl.BlockSpec((8, c_pad), lambda i, kk: (i, 0)),
                 pl.BlockSpec((8, c_pad), lambda i, kk: (i, 0))),
      scratch_shapes=[pltpu.VMEM((tm, c_pad), jnp.float32)],
      compiler_params=pltpu.CompilerParams(
          dimension_semantics=("parallel", "arbitrary"),
          vmem_limit_bytes=VMEM_LIMIT),
  )(p, w)

  ch_sum = psum.reshape(nm, 8, c_pad)[:, 0, :].sum(axis=0)
  ch_sumsq = psq.reshape(nm, 8, c_pad)[:, 0, :].sum(axis=0)
  return z, ch_sum, ch_sumsq, (m, cout, tm, m_pad, c_pad)


def _bn_fold(gamma, beta, ch_sum, ch_sumsq, m_true, c_pad):
  """Fold training-mode BN into a single per-channel scale/shift."""
  cout = gamma.shape[0]
  mean = ch_sum / m_true
  var = jnp.maximum(ch_sumsq / m_true - mean * mean, 0.0)
  g = jnp.pad(gamma.astype(jnp.float32), (0, c_pad - cout))
  b = jnp.pad(beta.astype(jnp.float32), (0, c_pad - cout))
  scale = g * lax.rsqrt(var + EPS)
  shift = b - mean * scale
  return scale.reshape(1, c_pad), shift.reshape(1, c_pad)


# --------------------------------------------------------------------------
# Kernel 2: fused normalize (+ residual-with-its-own-BN-affine) (+ ReLU).
# --------------------------------------------------------------------------
def _make_bn_act_kernel(relu, has_residual):
  def kernel(*refs):
    if has_residual:
      z_ref, sc_ref, sh_ref, r_ref, rsc_ref, rsh_ref, o_ref = refs
    else:
      z_ref, sc_ref, sh_ref, o_ref = refs
    y = z_ref[...] * sc_ref[...] + sh_ref[...]
    if has_residual:
      y = y + (r_ref[...] * rsc_ref[...] + rsh_ref[...])
    if relu:
      y = jnp.maximum(y, 0.0)
    o_ref[...] = y.astype(o_ref.dtype)
  return kernel


def _bn_act(z, scale, shift, *, tm, relu, out_dtype=jnp.float32,
            residual=None, res_scale=None, res_shift=None):
  m_pad, c_pad = z.shape
  nm = m_pad // tm
  args = [z, scale, shift]
  in_specs = [pl.BlockSpec((tm, c_pad), lambda i: (i, 0)),
              pl.BlockSpec((1, c_pad), lambda i: (0, 0)),
              pl.BlockSpec((1, c_pad), lambda i: (0, 0))]
  if residual is not None:
    args += [residual, res_scale, res_shift]
    in_specs += [pl.BlockSpec((tm, c_pad), lambda i: (i, 0)),
                 pl.BlockSpec((1, c_pad), lambda i: (0, 0)),
                 pl.BlockSpec((1, c_pad), lambda i: (0, 0))]
  return pl.pallas_call(
      _make_bn_act_kernel(relu, residual is not None),
      out_shape=jax.ShapeDtypeStruct((m_pad, c_pad), out_dtype),
      grid=(nm,),
      in_specs=in_specs,
      out_specs=pl.BlockSpec((tm, c_pad), lambda i: (i, 0)),
      compiler_params=pltpu.CompilerParams(
          dimension_semantics=("parallel",),
          vmem_limit_bytes=VMEM_LIMIT),
  )(*args)


# --------------------------------------------------------------------------
# JAX glue: im2col, weight layout, parameter init, block forward.
# --------------------------------------------------------------------------
def _im2col_3x3(x_nhwc, stride):
  n, h, w, c = x_nhwc.shape
  pad = 1
  ho = (h + 2 * pad - 3) // stride + 1
  wo = (w + 2 * pad - 3) // stride + 1
  xp = jnp.pad(x_nhwc, ((0, 0), (pad, pad), (pad, pad), (0, 0)))
  cols = []
  for kh in range(3):
    for kw in range(3):
      cols.append(xp[:, kh:kh + stride * ho:stride,
                     kw:kw + stride * wo:stride, :])
  patches = jnp.concatenate(cols, axis=-1).reshape(n * ho * wo, 9 * c)
  return patches, ho, wo


def _w_as_matrix(w_oihw):
  cout, cin, kh, kw = w_oihw.shape
  # OIHW -> (kh, kw, Cin, Cout) -> (K, Cout), matching the im2col column order.
  return jnp.transpose(w_oihw, (2, 3, 1, 0)).reshape(kh * kw * cin, cout)


def _conv_bn(patches, w_oihw, gamma, beta):
  z, ch_sum, ch_sumsq, meta = _conv_matmul_stats(patches, _w_as_matrix(w_oihw))
  m, _, _, _, c_pad = meta
  scale, shift = _bn_fold(gamma, beta, ch_sum, ch_sumsq, m, c_pad)
  return z, scale, shift, meta


def init_basic_block_params(key, in_channels, out_channels, stride):
  """Deterministic synthetic parameters matching BasicBlock.__init__ shapes."""
  ks = jax.random.split(key, 6)
  c_out = out_channels  # expansion == 1
  params = {
      # resblock[0]: Conv2d(in, out, 3, stride, padding=1)
      "w1": 0.1 * jax.random.normal(ks[0], (c_out, in_channels, 3, 3), jnp.float32),
      "b1": 0.1 * jax.random.normal(ks[1], (c_out,), jnp.float32),
      # resblock[1]: BatchNorm2d(out)
      "g1": 1.0 + 0.05 * jnp.arange(c_out, dtype=jnp.float32),
      "beta1": 0.01 * jnp.arange(c_out, dtype=jnp.float32),
      # resblock[3]: Conv2d(out, out, 3, 1, padding=1)
      "w2": 0.1 * jax.random.normal(ks[2], (c_out, c_out, 3, 3), jnp.float32),
      "b2": 0.1 * jax.random.normal(ks[3], (c_out,), jnp.float32),
      # resblock[4]: BatchNorm2d(out)
      "g2": 1.0 - 0.03 * jnp.arange(c_out, dtype=jnp.float32),
      "beta2": -0.02 * jnp.arange(c_out, dtype=jnp.float32),
      "ws": None,
  }
  if stride != 1 or in_channels != c_out:
    # shortcut: Conv2d(in, out, 1, stride) + BatchNorm2d(out)
    params["ws"] = 0.1 * jax.random.normal(ks[4], (c_out, in_channels, 1, 1),
                                           jnp.float32)
    params["bs"] = 0.1 * jax.random.normal(ks[5], (c_out,), jnp.float32)
    params["gs"] = 1.0 + 0.02 * jnp.arange(c_out, dtype=jnp.float32)
    params["betas"] = 0.03 * jnp.arange(c_out, dtype=jnp.float32)
  return params


@functools.partial(jax.jit, static_argnames=("stride",))
def basic_block_forward(params, x_nchw, stride):
  """forward(x) = ReLU(resblock(x) + shortcut(x)), x in NCHW (training-mode BN).

  NOTE: conv biases (b1/b2/bs) are intentionally not applied: training-mode
  BatchNorm's mean subtraction cancels them exactly.
  """
  x = jnp.transpose(x_nchw, (0, 2, 3, 1)).astype(jnp.float32)  # NCHW -> NHWC
  n, h, w, cin = x.shape
  cout = params["w1"].shape[0]

  # ---- main branch, conv1: 3x3(stride) + BN + ReLU -------------------------
  p1, ho, wo = _im2col_3x3(x, stride)
  z1, sc1, sh1, (m, _, tm1, _, _) = _conv_bn(
      p1, params["w1"], params["g1"], params["beta1"])
  h1 = _bn_act(z1, sc1, sh1, tm=tm1, relu=True, out_dtype=jnp.bfloat16)
  h1 = h1[:m, :cout].reshape(n, ho, wo, cout)

  # ---- main branch, conv2: 3x3(1) + BN --------------------------------------
  p2, _, _ = _im2col_3x3(h1, 1)
  z2, sc2, sh2, (m2, _, tm2, m_pad2, c_pad2) = _conv_bn(
      p2, params["w2"], params["g2"], params["beta2"])

  # ---- shortcut --------------------------------------------------------------
  if params["ws"] is not None:
    # 1x1 conv: patches are just the strided input -> no im2col duplication.
    ps = x[:, ::stride, ::stride, :].reshape(m2, cin)
    zs, scs, shs, _ = _conv_bn(ps, params["ws"], params["gs"], params["betas"])
    res, res_scale, res_shift = zs, scs, shs
  else:
    res = jnp.pad(x.reshape(m2, cin),
                  ((0, m_pad2 - m2), (0, c_pad2 - cin)))
    res_scale = jnp.ones((1, c_pad2), jnp.float32)
    res_shift = jnp.zeros((1, c_pad2), jnp.float32)

  # ---- final fused: BN(conv2) + BN-affine(shortcut) + add + ReLU ------------
  out = _bn_act(z2, sc2, sh2, tm=tm2, relu=True,
                residual=res, res_scale=res_scale, res_shift=res_shift)
  out = out[:m2, :cout].reshape(n, ho, wo, cout)
  return jnp.transpose(out, (0, 3, 1, 2))  # NHWC -> NCHW


if __name__ == "__main__":
  key = jax.random.PRNGKey(0)
  kx, kp = jax.random.split(key)

  N, C_IN, H, W = 2, 4, 16, 16
  C_OUT, STRIDE = 8, 2

  x = jax.random.normal(kx, (N, C_IN, H, W), jnp.float32)
  params = init_basic_block_params(kp, C_IN, C_OUT, STRIDE)

  y = basic_block_forward(params, x, STRIDE)
  jax.block_until_ready(y)
  assert y.shape == (N, C_OUT, H // STRIDE, W // STRIDE)
  print("KERNEL_OK")
</pallas_src>

<mosaic_0001>
module attributes {stable_mosaic.version = 11 : i64} {
  func.func @kernel(%arg0: i32, %arg1: memref<128x128xf32, #tpu.memory_space<vmem>>, %arg2: memref<1x128xf32, #tpu.memory_space<vmem>>, %arg3: memref<1x128xf32, #tpu.memory_space<vmem>>, %arg4: memref<128x128xbf16, #tpu.memory_space<vmem>>) attributes {dimension_semantics = [#tpu.dimension_semantics<parallel>], iteration_bounds = array<i64: 1>, scalar_prefetch = 0 : i64, scratch_operands = 0 : i64, tpu.core_type = #tpu.core_type<tc>, window_params = [{transform_indices = @transform_0, window_bounds = array<i64: 128, 128>}, {pipeline_mode = #tpu.pipeline_mode<synchronous>, transform_indices = @transform_1, window_bounds = array<i64: 1, 128>}, {pipeline_mode = #tpu.pipeline_mode<synchronous>, transform_indices = @transform_2, window_bounds = array<i64: 1, 128>}, {transform_indices = @transform_3, window_bounds = array<i64: 128, 128>}]} {
    %c0 = arith.constant 0 : index
    %c0_0 = arith.constant 0 : index
    %0 = vector.load %arg1[%c0, %c0_0] : memref<128x128xf32, #tpu.memory_space<vmem>>, vector<128x128xf32>
    %c0_1 = arith.constant 0 : index
    %c0_2 = arith.constant 0 : index
    %1 = vector.load %arg2[%c0_1, %c0_2] : memref<1x128xf32, #tpu.memory_space<vmem>>, vector<1x128xf32>
    %2 = vector.broadcast %1 : vector<1x128xf32> to vector<128x128xf32>
    %3 = arith.mulf %0, %2 : vector<128x128xf32>
    %c0_3 = arith.constant 0 : index
    %c0_4 = arith.constant 0 : index
    %4 = vector.load %arg3[%c0_3, %c0_4] : memref<1x128xf32, #tpu.memory_space<vmem>>, vector<1x128xf32>
    %5 = vector.broadcast %4 : vector<1x128xf32> to vector<128x128xf32>
    %6 = arith.addf %3, %5 : vector<128x128xf32>
    %cst = arith.constant 0.000000e+00 : f32
    %7 = vector.broadcast %cst : f32 to vector<128x128xf32>
    %8 = arith.maximumf %6, %7 : vector<128x128xf32>
    %9 = arith.truncf %8 : vector<128x128xf32> to vector<128x128xbf16>
    %c0_5 = arith.constant 0 : index
    %c0_6 = arith.constant 0 : index
    %10 = vector.load %arg4[%c0_5, %c0_6] : memref<128x128xbf16, #tpu.memory_space<vmem>>, vector<128x128xbf16>
    tpu.vector_store %arg4[%c0_5, %c0_6], %9 {strides = array<i32>} : memref<128x128xbf16, #tpu.memory_space<vmem>>, vector<128x128xbf16>,
    return
  }
  func.func @transform_0(%arg0: i32) -> (i32, i32) {
    %c0_i32 = arith.constant 0 : i32
    %c0_i32_0 = arith.constant 0 : i32
    return %arg0, %c0_i32 : i32, i32
  }
  func.func @transform_1(%arg0: i32) -> (i32, i32) {
    %c0_i32 = arith.constant 0 : i32
    %c0_i32_0 = arith.constant 0 : i32
    %c0_i32_1 = arith.constant 0 : i32
    return %c0_i32, %c0_i32_0 : i32, i32
  }
  func.func @transform_2(%arg0: i32) -> (i32, i32) {
    %c0_i32 = arith.constant 0 : i32
    %c0_i32_0 = arith.constant 0 : i32
    %c0_i32_1 = arith.constant 0 : i32
    return %c0_i32, %c0_i32_0 : i32, i32
  }
  func.func @transform_3(%arg0: i32) -> (i32, i32) {
    %c0_i32 = arith.constant 0 : i32
    %c0_i32_0 = arith.constant 0 : i32
    return %arg0, %c0_i32 : i32, i32
  }
}

module attributes {stable_mosaic.version = 11 : i64} {
  func.func @_conv_stats_kernel(%arg0: i32, %arg1: i32, %arg2: memref<128x128xbf16, #tpu.memory_space<vmem>>, %arg3: memref<128x128xbf16, #tpu.memory_space<vmem>>, %arg4: memref<128x128xf32, #tpu.memory_space<vmem>>, %arg5: memref<8x128xf32, #tpu.memory_space<vmem>>, %arg6: memref<8x128xf32, #tpu.memory_space<vmem>>, %arg7: memref<128x128xf32, #tpu.memory_space<vmem>>) attributes {dimension_semantics = [#tpu.dimension_semantics<parallel>, #tpu.dimension_semantics<arbitrary>], iteration_bounds = array<i64: 1, 1>, scalar_prefetch = 0 : i64, scratch_operands = 1 : i64, tpu.core_type = #tpu.core_type<tc>, window_params = [{transform_indices = @transform_0, window_bounds = array<i64: 128, 128>}, {transform_indices = @transform_1, window_bounds = array<i64: 128, 128>}, {transform_indices = @transform_2, window_bounds = array<i64: 128, 128>}, {transform_indices = @transform_3, window_bounds = array<i64: 8, 128>}, {transform_indices = @transform_4, window_bounds = array<i64: 8, 128>}]} {
    %c0_i32 = arith.constant 0 : i32
    %0 = arith.cmpi eq, %arg1, %c0_i32 : i32
    %1 = arith.extui %0 : i1 to i32
    %c0_i32_0 = arith.constant 0 : i32
    %2 = arith.cmpi ne, %1, %c0_i32_0 : i32
    scf.if %2 {
      %cst_10 = arith.constant 0.000000e+00 : f32
      %12 = vector.broadcast %cst_10 : f32 to vector<128x128xf32>
      %c0_11 = arith.constant 0 : index
      %c0_12 = arith.constant 0 : index
      %13 = vector.load %arg7[%c0_11, %c0_12] : memref<128x128xf32, #tpu.memory_space<vmem>>, vector<128x128xf32>
      tpu.vector_store %arg7[%c0_11, %c0_12], %12 {strides = array<i32>} : memref<128x128xf32, #tpu.memory_space<vmem>>, vector<128x128xf32>,
    } else {
    }
    %c0 = arith.constant 0 : index
    %c0_1 = arith.constant 0 : index
    %3 = vector.load %arg7[%c0, %c0_1] : memref<128x128xf32, #tpu.memory_space<vmem>>, vector<128x128xf32>
    %c0_2 = arith.constant 0 : index
    %c0_3 = arith.constant 0 : index
    %4 = vector.load %arg2[%c0_2, %c0_3] : memref<128x128xbf16, #tpu.memory_space<vmem>>, vector<128x128xbf16>
    %c0_4 = arith.constant 0 : index
    %c0_5 = arith.constant 0 : index
    %5 = vector.load %arg3[%c0_4, %c0_5] : memref<128x128xbf16, #tpu.memory_space<vmem>>, vector<128x128xbf16>
    %cst = arith.constant dense<0.000000e+00> : vector<128x128xf32>
    %6 = tpu.matmul %4, %5, %cst {dimension_numbers = #tpu.dot_dimension_numbers<[1], [0], [0], [1], [0, 0, 1, 1], [], []>} : vector<128x128xbf16>, vector<128x128xbf16>, vector<128x128xf32> -> vector<128x128xf32>
    %7 = arith.addf %3, %6 : vector<128x128xf32>
    %c0_6 = arith.constant 0 : index
    %c0_7 = arith.constant 0 : index
    %8 = vector.load %arg7[%c0_6, %c0_7] : memref<128x128xf32, #tpu.memory_space<vmem>>, vector<128x128xf32>
    tpu.vector_store %arg7[%c0_6, %c0_7], %7 {strides = array<i32>} : memref<128x128xf32, #tpu.memory_space<vmem>>, vector<128x128xf32>,
    %c0_i32_8 = arith.constant 0 : i32
    %9 = arith.cmpi eq, %arg1, %c0_i32_8 : i32
    %10 = arith.extui %9 : i1 to i32
    %c0_i32_9 = arith.constant 0 : i32
    %11 = arith.cmpi ne, %10, %c0_i32_9 : i32
    scf.if %11 {
      %c0_10 = arith.constant 0 : index
      %c0_11 = arith.constant 0 : index
      %12 = vector.load %arg7[%c0_10, %c0_11] : memref<128x128xf32, #tpu.memory_space<vmem>>, vector<128x128xf32>
      %c0_12 = arith.constant 0 : index
      %c0_13 = arith.constant 0 : index
      %13 = vector.load %arg4[%c0_12, %c0_13] : memref<128x128xf32, #tpu.memory_space<vmem>>, vector<128x128xf32>
      tpu.vector_store %arg4[%c0_12, %c0_13], %12 {strides = array<i32>} : memref<128x128xf32, #tpu.memory_space<vmem>>, vector<128x128xf32>,
      %cst_14 = arith.constant dense<0.000000e+00> : vector<128xf32>
      %14 = vector.multi_reduction <add>, %12, %cst_14 [0] : vector<128x128xf32> to vector<128xf32>
      %15 = vector.shape_cast %14 : vector<128xf32> to vector<1x128xf32>
      %16 = vector.shape_cast %15 : vector<1x128xf32> to vector<1x128xf32>
      %17 = vector.broadcast %16 : vector<1x128xf32> to vector<8x128xf32>
      %c0_15 = arith.constant 0 : index
      %c0_16 = arith.constant 0 : index
      %18 = vector.load %arg5[%c0_15, %c0_16] : memref<8x128xf32, #tpu.memory_space<vmem>>, vector<8x128xf32>
      tpu.vector_store %arg5[%c0_15, %c0_16], %17 {strides = array<i32>} : memref<8x128xf32, #tpu.memory_space<vmem>>, vector<8x128xf32>,
      %19 = arith.mulf %12, %12 : vector<128x128xf32>
      %cst_17 = arith.constant dense<0.000000e+00> : vector<128xf32>
      %20 = vector.multi_reduction <add>, %19, %cst_17 [0] : vector<128x128xf32> to vector<128xf32>
      %21 = vector.shape_cast %20 : vector<128xf32> to vector<1x128xf32>
      %22 = vector.shape_cast %21 : vector<1x128xf32> to vector<1x128xf32>
      %23 = vector.broadcast %22 : vector<1x128xf32> to vector<8x128xf32>
      %c0_18 = arith.constant 0 : index
      %c0_19 = arith.constant 0 : index
      %24 = vector.load %arg6[%c0_18, %c0_19] : memref<8x128xf32, #tpu.memory_space<vmem>>, vector<8x128xf32>
      tpu.vector_store %arg6[%c0_18, %c0_19], %23 {strides = array<i32>} : memref<8x128xf32, #tpu.memory_space<vmem>>, vector<8x128xf32>,
    } else {
    }
    return
  }
  func.func @transform_0(%arg0: i32, %arg1: i32) -> (i32, i32) {
    %c0_i32 = arith.constant 0 : i32
    return %arg0, %arg1 : i32, i32
  }
  func.func @transform_1(%arg0: i32, %arg1: i32) -> (i32, i32) {
    %c0_i32 = arith.constant 0 : i32
    %c0_i32_0 = arith.constant 0 : i32
    return %arg1, %c0_i32 : i32, i32
  }
  func.func @transform_2(%arg0: i32, %arg1: i32) -> (i32, i32) {
    %c0_i32 = arith.constant 0 : i32
    %c0_i32_0 = arith.constant 0 : i32
    return %arg0, %c0_i32 : i32, i32
  }
  func.func @transform_3(%arg0: i32, %arg1: i32) -> (i32, i32) {
    %c0_i32 = arith.constant 0 : i32
    %c0_i32_0 = arith.constant 0 : i32
    return %arg0, %c0_i32 : i32, i32
  }
  func.func @transform_4(%arg0: i32, %arg1: i32) -> (i32, i32) {
    %c0_i32 = arith.constant 0 : i32
    %c0_i32_0 = arith.constant 0 : i32
    return %arg0, %c0_i32 : i32, i32
  }
}

module attributes {stable_mosaic.version = 11 : i64} {
  func.func @kernel(%arg0: i32, %arg1: memref<128x128xf32, #tpu.memory_space<vmem>>, %arg2: memref<1x128xf32, #tpu.memory_space<vmem>>, %arg3: memref<1x128xf32, #tpu.memory_space<vmem>>, %arg4: memref<128x128xf32, #tpu.memory_space<vmem>>, %arg5: memref<1x128xf32, #tpu.memory_space<vmem>>, %arg6: memref<1x128xf32, #tpu.memory_space<vmem>>, %arg7: memref<128x128xf32, #tpu.memory_space<vmem>>) attributes {dimension_semantics = [#tpu.dimension_semantics<parallel>], iteration_bounds = array<i64: 1>, scalar_prefetch = 0 : i64, scratch_operands = 0 : i64, tpu.core_type = #tpu.core_type<tc>, window_params = [{transform_indices = @transform_0, window_bounds = array<i64: 128, 128>}, {pipeline_mode = #tpu.pipeline_mode<synchronous>, transform_indices = @transform_1, window_bounds = array<i64: 1, 128>}, {pipeline_mode = #tpu.pipeline_mode<synchronous>, transform_indices = @transform_2, window_bounds = array<i64: 1, 128>}, {transform_indices = @transform_3, window_bounds = array<i64: 128, 128>}, {pipeline_mode = #tpu.pipeline_mode<synchronous>, transform_indices = @transform_4, window_bounds = array<i64: 1, 128>}, {pipeline_mode = #tpu.pipeline_mode<synchronous>, transform_indices = @transform_5, window_bounds = array<i64: 1, 128>}, {transform_indices = @transform_6, window_bounds = array<i64: 128, 128>}]} {
    %c0 = arith.constant 0 : index
    %c0_0 = arith.constant 0 : index
    %0 = vector.load %arg1[%c0, %c0_0] : memref<128x128xf32, #tpu.memory_space<vmem>>, vector<128x128xf32>
    %c0_1 = arith.constant 0 : index
    %c0_2 = arith.constant 0 : index
    %1 = vector.load %arg2[%c0_1, %c0_2] : memref<1x128xf32, #tpu.memory_space<vmem>>, vector<1x128xf32>
    %2 = vector.broadcast %1 : vector<1x128xf32> to vector<128x128xf32>
    %3 = arith.mulf %0, %2 : vector<128x128xf32>
    %c0_3 = arith.constant 0 : index
    %c0_4 = arith.constant 0 : index
    %4 = vector.load %arg3[%c0_3, %c0_4] : memref<1x128xf32, #tpu.memory_space<vmem>>, vector<1x128xf32>
    %5 = vector.broadcast %4 : vector<1x128xf32> to vector<128x128xf32>
    %6 = arith.addf %3, %5 : vector<128x128xf32>
    %c0_5 = arith.constant 0 : index
    %c0_6 = arith.constant 0 : index
    %7 = vector.load %arg4[%c0_5, %c0_6] : memref<128x128xf32, #tpu.memory_space<vmem>>, vector<128x128xf32>
    %c0_7 = arith.constant 0 : index
    %c0_8 = arith.constant 0 : index
    %8 = vector.load %arg5[%c0_7, %c0_8] : memref<1x128xf32, #tpu.memory_space<vmem>>, vector<1x128xf32>
    %9 = vector.broadcast %8 : vector<1x128xf32> to vector<128x128xf32>
    %10 = arith.mulf %7, %9 : vector<128x128xf32>
    %c0_9 = arith.constant 0 : index
    %c0_10 = arith.constant 0 : index
    %11 = vector.load %arg6[%c0_9, %c0_10] : memref<1x128xf32, #tpu.memory_space<vmem>>, vector<1x128xf32>
    %12 = vector.broadcast %11 : vector<1x128xf32> to vector<128x128xf32>
    %13 = arith.addf %10, %12 : vector<128x128xf32>
    %14 = arith.addf %6, %13 : vector<128x128xf32>
    %cst = arith.constant 0.000000e+00 : f32
    %15 = vector.broadcast %cst : f32 to vector<128x128xf32>
    %16 = arith.maximumf %14, %15 : vector<128x128xf32>
    %c0_11 = arith.constant 0 : index
    %c0_12 = arith.constant 0 : index
    %17 = vector.load %arg7[%c0_11, %c0_12] : memref<128x128xf32, #tpu.memory_space<vmem>>, vector<128x128xf32>
    tpu.vector_store %arg7[%c0_11, %c0_12], %16 {strides = array<i32>} : memref<128x128xf32, #tpu.memory_space<vmem>>, vector<128x128xf32>,
    return
  }
  func.func @transform_0(%arg0: i32) -> (i32, i32) {
    %c0_i32 = arith.constant 0 : i32
    %c0_i32_0 = arith.constant 0 : i32
    return %arg0, %c0_i32 : i32, i32
  }
  func.func @transform_1(%arg0: i32) -> (i32, i32) {
    %c0_i32 = arith.constant 0 : i32
    %c0_i32_0 = arith.constant 0 : i32
    %c0_i32_1 = arith.constant 0 : i32
    return %c0_i32, %c0_i32_0 : i32, i32
  }
  func.func @transform_2(%arg0: i32) -> (i32, i32) {
    %c0_i32 = arith.constant 0 : i32
    %c0_i32_0 = arith.constant 0 : i32
    %c0_i32_1 = arith.constant 0 : i32
    return %c0_i32, %c0_i32_0 : i32, i32
  }
  func.func @transform_3(%arg0: i32) -> (i32, i32) {
    %c0_i32 = arith.constant 0 : i32
    %c0_i32_0 = arith.constant 0 : i32
    return %arg0, %c0_i32 : i32, i32
  }
  func.func @transform_4(%arg0: i32) -> (i32, i32) {
    %c0_i32 = arith.constant 0 : i32
    %c0_i32_0 = arith.constant 0 : i32
    %c0_i32_1 = arith.constant 0 : i32
    return %c0_i32, %c0_i32_0 : i32, i32
  }
  func.func @transform_5(%arg0: i32) -> (i32, i32) {
    %c0_i32 = arith.constant 0 : i32
    %c0_i32_0 = arith.constant 0 : i32
    %c0_i32_1 = arith.constant 0 : i32
    return %c0_i32, %c0_i32_0 : i32, i32
  }
  func.func @transform_6(%arg0: i32) -> (i32, i32) {
    %c0_i32 = arith.constant 0 : i32
    %c0_i32_0 = arith.constant 0 : i32
    return %arg0, %c0_i32 : i32, i32
  }
}

</mosaic_0001>

<bundles_post_ra>
// kernel: basic_block_forward.6
= control target key start
LH: loop header
LB: loop body
LE: loop exit
PB: predicated region body
PF: predicated region fallthrough
CT: control target
= control target key end

     0   :  { %s391_s0 = inlined_call_operand.vmem [shape: f32[128,128], index: 0, kind: input, shape index: {}]   ;;  %s392_s1 = inlined_call_operand.vmem [shape: f32[1,128], index: 1, kind: input, shape index: {}]   ;;  %s393_s2 = inlined_call_operand.vmem [shape: f32[1,128], index: 2, kind: input, shape index: {}]   ;;  %s394_s3 = inlined_call_operand.vmem [shape: bf16[128,128], index: 3, kind: output, shape index: {}]  }
   0x1   :  { %v14_v0 = vld [vmem:[%s391_s0] sm:$0xff]  ;;  %v15_v1 = vld [vmem:[%s391_s0 + $0x8] sm:$0xff]  ;;  %v16_v6 = vld [vmem:[%s391_s0 + $0x10] sm:$0xff] }
   0x2   :  { %v286_v2 = vld [vmem:[%s392_s1] ss:$0 sm:$0xff]  ;;  %v17_v7 = vld [vmem:[%s391_s0 + $0x18] sm:$0xff]  ;;  %v19_v11 = vld [vmem:[%s391_s0 + $0x28] sm:$0xff] }
   0x3   :  { %v37_v3 = vmul.f32 %v286_v2, %v14_v0  ;;  %v38_v4 = vmul.f32 %v286_v2, %v15_v1  ;;  %v293_v5 = vld [vmem:[%s393_s2] ss:$0 sm:$0xff]  ;;  %v39_v8 = vmul.f32 %v286_v2, %v16_v6  ;;  %v40_v9 = vmul.f32 %v286_v2, %v17_v7  ;;  %v20_v12 = vld [vmem:[%s391_s0 + $0x30] sm:$0xff]  ;;  %v21_v17 = vld [vmem:[%s391_s0 + $0x38] sm:$0xff] }
   0x4   :  { %v18_v10 = vld [vmem:[%s391_s0 + $0x20] sm:$0xff]  ;;  %v42_v16 = vmul.f32 %v286_v2, %v19_v11  ;;  %v43_v20 = vmul.f32 %v286_v2, %v20_v12  ;;  %v44_v21 = vmul.f32 %v286_v2, %v21_v17  ;;  %v23_v27 = vld [vmem:[%s391_s0 + $0x48] sm:$0xff]  ;;  %v24_v32 = vld [vmem:[%s391_s0 + $0x50] sm:$0xff] }
   0x5   :  { %v60_v13 = vadd.f32 %v293_v5, %v37_v3  ;;  %v61_v14 = vadd.f32 %v293_v5, %v38_v4  ;;  %v41_v15 = vmul.f32 %v286_v2, %v18_v10  ;;  %v62_v18 = vadd.f32 %v293_v5, %v39_v8  ;;  %v22_v22 = vld [vmem:[%s391_s0 + $0x40] sm:$0xff]  ;;  %v25_v33 = vld [vmem:[%s391_s0 + $0x58] sm:$0xff]  ;;  %v27_v39 = vld [vmem:[%s391_s0 + $0x68] sm:$0xff] }
   0x6   :  { %v63_v19 = vadd.f32 %v293_v5, %v40_v9  ;;  %v65_v26 = vadd.f32 %v293_v5, %v42_v16  ;;  %v66_v30 = vadd.f32 %v293_v5, %v43_v20  ;;  %v67_v31 = vadd.f32 %v293_v5, %v44_v21  ;;  %v26_v38 = vld [vmem:[%s391_s0 + $0x60] sm:$0xff]  ;;  %v28_v44 = vld [vmem:[%s391_s0 + $0x70] sm:$0xff]  ;;  %v29_v49 = vld [vmem:[%s391_s0 + $0x78] sm:$0xff] }
   0x7   :  { %v76_v23 = vmax.f32 %v60_v13, 0.0  ;;  %v77_v24 = vmax.f32 %v61_v14, 0.0  ;;  %v64_v25 = vadd.f32 %v293_v5, %v41_v15  ;;  %v78_v28 = vmax.f32 %v62_v18, 0.0 }
   0x8   :  { %v79_v29 = vmax.f32 %v63_v19, 0.0  ;;  %v81_v36 = vmax.f32 %v65_v26, 0.0  ;;  %v45_v37 = vmul.f32 %v286_v2, %v22_v22  ;;  %v82_v41 = vmax.f32 %v66_v30, 0.0 }
   0x9   :  { %v213_v34 = vpack.c.bf16 %v77_v24, %v76_v23  ;;  %v80_v35 = vmax.f32 %v64_v25, 0.0  ;;  %v83_v42 = vmax.f32 %v67_v31, 0.0  ;;  %v46_v43 = vmul.f32 %v286_v2, %v23_v27 }
   0xa   :  { %v218_v40 = vpack.c.bf16 %v79_v29, %v78_v28  ;;  %v68_v46 = vadd.f32 %v293_v5, %v45_v37  ;;  %v47_v47 = vmul.f32 %v286_v2, %v24_v32  ;;  %v48_v48 = vmul.f32 %v286_v2, %v25_v33 }
   0xb   :  { %214 = vst [vmem:[%s394_s3] sm:$0xff] %v213_v34   ;;  %v223_v45 = vpack.c.bf16 %v81_v36, %v80_v35  ;;  %v228_v50 = vpack.c.bf16 %v83_v42, %v82_v41  ;;  %v69_v51 = vadd.f32 %v293_v5, %v46_v43  ;;  %v49_v52 = vmul.f32 %v286_v2, %v26_v38 }
   0xc   :  { %250 = vst [vmem:[%s394_s3 + $0x8] sm:$0xff] %v218_v40   ;;  %v50_v53 = vmul.f32 %v286_v2, %v27_v39  ;;  %v84_v54 = vmax.f32 %v68_v46, 0.0  ;;  %v70_v55 = vadd.f32 %v293_v5, %v47_v47  ;;  %v71_v56 = vadd.f32 %v293_v5, %v48_v48 }
   0xd   :  { %251 = vst [vmem:[%s394_s3 + $0x10] sm:$0xff] %v223_v45   ;;  %v51_v57 = vmul.f32 %v286_v2, %v28_v44  ;;  %252 = vst [vmem:[%s394_s3 + $0x18] sm:$0xff] %v228_v50   ;;  %v85_v58 = vmax.f32 %v69_v51, 0.0  ;;  %v72_v59 = vadd.f32 %v293_v5, %v49_v52  ;;  %v52_v61 = vmul.f32 %v286_v2, %v29_v49 }
   0xe   :  { %v73_v60 = vadd.f32 %v293_v5, %v50_v53  ;;  %v86_v62 = vmax.f32 %v70_v55, 0.0  ;;  %v87_v63 = vmax.f32 %v71_v56, 0.0 }
   0xf   :  { %v74_v0 = vadd.f32 %v293_v5, %v51_v57  ;;  %v233_v1 = vpack.c.bf16 %v85_v58, %v84_v54  ;;  %v88_v3 = vmax.f32 %v72_v59, 0.0  ;;  %v75_v6 = vadd.f32 %v293_v5, %v52_v61 }
  0x10   :  { %v89_v4 = vmax.f32 %v73_v60, 0.0  ;;  %v238_v7 = vpack.c.bf16 %v87_v63, %v86_v62 }
  0x11   :  { %v90_v8 = vmax.f32 %v74_v0, 0.0  ;;  %253 = vst [vmem:[%s394_s3 + $0x20] sm:$0xff] %v233_v1   ;;  %v91_v10 = vmax.f32 %v75_v6, 0.0 }
  0x12   :  { %v243_v9 = vpack.c.bf16 %v89_v4, %v88_v3  ;;  %254 = vst [vmem:[%s394_s3 + $0x28] sm:$0xff] %v238_v7  }
  0x13   :  { %v248_v2 = vpack.c.bf16 %v91_v10, %v90_v8 }
  0x14   :  { %255 = vst [vmem:[%s394_s3 + $0x30] sm:$0xff] %v243_v9  }
  0x15   :  { %256 = vst [vmem:[%s394_s3 + $0x38] sm:$0xff] %v248_v2  }

// kernel: basic_block_forward.5
= control target key start
LH: loop header
LB: loop body
LE: loop exit
PB: predicated region body
PF: predicated region fallthrough
CT: control target
= control target key end

     0   :  { %s638_s1 = inlined_call_operand.vmem [shape: bf16[128,128], index: 1, kind: input, shape index: {}]   ;;  %s639_s0 = inlined_call_operand.vmem [shape: bf16[128,128], index: 0, kind: input, shape index: {}]   ;;  %s640_s2 = inlined_call_operand.vmem [shape: f32[128,128], index: 2, kind: output, shape index: {0}]   ;;  %s641_s3 = inlined_call_operand.vmem [shape: f32[8,128], index: 3, kind: output, shape index: {1}]   ;;  %s642_s4 = inlined_call_operand.vmem [shape: f32[8,128], index: 4, kind: output, shape index: {2}]  }
   0x1   :  { %v495_v0 = vld [vmem:[%s638_s1] sm:$0xff]   ;;  %v496_v1 = vld [vmem:[%s638_s1 + $0x8] sm:$0xff]   ;;  %v497_v2 = vld [vmem:[%s638_s1 + $0x10] sm:$0xff]  }
   0x2   :  { %447 = vmatprep.subr.bf16.mxu0 %v495_v0  ;;  %479 = vmatprep.subr.bf16.mxu1 %v495_v0  ;;  %v498_v3 = vld [vmem:[%s638_s1 + $0x18] sm:$0xff]   ;;  %v503_v4 = vld [vmem:[%s639_s0] sm:$0xff]   ;;  %v500_v7 = vld [vmem:[%s638_s1 + $0x28] sm:$0xff]  }
   0x3   :  { %448 = vmatpush3.bf16.msra.mxu0 %v495_v0  ;;  %487 = vmatpush3.bf16.msra.mxu1 %v495_v0  ;;  %v499_v5 = vld [vmem:[%s638_s1 + $0x20] sm:$0xff]   ;;  %v501_v8 = vld [vmem:[%s638_s1 + $0x30] sm:$0xff]   ;;  %v502_v9 = vld [vmem:[%s638_s1 + $0x38] sm:$0xff]  }
   0x4   :  { %449 = vmatprep.subr.bf16.mxu0 %v496_v1  ;;  %480 = vmatprep.subr.bf16.mxu1 %v496_v1  ;;  %v507_v6 = vld [vmem:[%s639_s0 + $0x20] sm:$0xff]   ;;  %v504_v10 = vld [vmem:[%s639_s0 + $0x8] sm:$0xff]   ;;  %v505_v12 = vld [vmem:[%s639_s0 + $0x10] sm:$0xff]  }
   0x5   :  { %463 = vmatprep.mubr.bf16.mxu0 %v503_v4  ;;  %471 = vmatprep.mubr.bf16.mxu1 %v507_v6  ;;  %v508_v11 = vld [vmem:[%s639_s0 + $0x28] sm:$0xff]   ;;  %v509_v13 = vld [vmem:[%s639_s0 + $0x30] sm:$0xff]   ;;  %v506_v14 = vld [vmem:[%s639_s0 + $0x18] sm:$0xff]  }
   0x6   :  { %v510_v15 = vld [vmem:[%s639_s0 + $0x38] sm:$0xff]  }
   0x7   :  { %450 = vmatpush3.bf16.msra.mxu0 %v496_v1  ;;  %488 = vmatpush3.bf16.msra.mxu1 %v496_v1 }
   0x8   :  { %451 = vmatprep.subr.bf16.mxu0 %v497_v2  ;;  %481 = vmatprep.subr.bf16.mxu1 %v497_v2 }
   0xb   :  { %452 = vmatpush3.bf16.msra.mxu0 %v497_v2  ;;  %489 = vmatpush3.bf16.msra.mxu1 %v497_v2 }
   0xc   :  { %453 = vmatprep.subr.bf16.mxu0 %v498_v3  ;;  %482 = vmatprep.subr.bf16.mxu1 %v498_v3 }
   0xf   :  { %454 = vmatpush3.bf16.msra.mxu0 %v498_v3  ;;  %490 = vmatpush3.bf16.msra.mxu1 %v498_v3 }
  0x10   :  { %455 = vmatprep.subr.bf16.mxu0 %v499_v5  ;;  %483 = vmatprep.subr.bf16.mxu1 %v499_v5 }
  0x13   :  { %456 = vmatpush3.bf16.msra.mxu0 %v499_v5  ;;  %491 = vmatpush3.bf16.msra.mxu1 %v499_v5 }
  0x14   :  { %457 = vmatprep.subr.bf16.mxu0 %v500_v7  ;;  %484 = vmatprep.subr.bf16.mxu1 %v500_v7 }
  0x17   :  { %458 = vmatpush3.bf16.msra.mxu0 %v500_v7  ;;  %492 = vmatpush3.bf16.msra.mxu1 %v500_v7 }
  0x18   :  { %459 = vmatprep.subr.bf16.mxu0 %v501_v8  ;;  %485 = vmatprep.subr.bf16.mxu1 %v501_v8 }
  0x1b   :  { %460 = vmatpush3.bf16.msra.mxu0 %v501_v8  ;;  %493 = vmatpush3.bf16.msra.mxu1 %v501_v8 }
  0x1c   :  { %461 = vmatprep.subr.bf16.mxu0 %v502_v9  ;;  %486 = vmatprep.subr.bf16.mxu1 %v502_v9 }
  0x1f   :  { %462 = vmatpush3.bf16.msra.mxu0 %v502_v9  ;;  %494 = vmatpush3.bf16.msra.mxu1 %v502_v9 }
  0x22   :  { %464 = vmatmul.mubr.bf16.vlgmr.msra.gmra.mrb[0].mxu0 %v504_v10  ;;  %472 = vmatmul.mubr.bf16.vlgmr.msra.gmra.mrb[0].mxu1 %v508_v11 }
  0x23   :  { %467 = vmatprep.mubr.bf16.mxu0 %v505_v12  ;;  %475 = vmatprep.mubr.bf16.mxu1 %v509_v13 }
  0x2a   :  { %468 = vmatmul.mubr.bf16.gmra.mrb[4].mxu0 %v506_v14  ;;  %476 = vmatmul.mubr.bf16.gmra.mrb[4].mxu1 %v510_v15 }
  0xf5   :  { %v465_v16 = vpop.f32.mrb[0].mxu0  ;;  %v473_v17 = vpop.f32.mrb[0].mxu1 }
  0xf6   :  { %329 = vst [vmem:[%s640_s2 + $0x10] sm:$0xff] %v465_v16  ;;  %v213_v18 = vpop.f32.mrb[1].mxu0  ;;  %337 = vst [vmem:[%s640_s2 + $0x50] sm:$0xff] %v473_v17  ;;  %v245_v19 = vpop.f32.mrb[1].mxu1  ;;  %v367_v27 = vmul.f32 %v465_v16, %v465_v16  ;;  %v375_v59 = vmul.f32 %v473_v17, %v473_v17 }
  0xf7   :  { %327 = vst [vmem:[%s640_s2] sm:$0xff] %v213_v18  ;;  %v466_v20 = vpop.f32.mrb[2].mxu0  ;;  %335 = vst [vmem:[%s640_s2 + $0x40] sm:$0xff] %v245_v19  ;;  %v474_v21 = vpop.f32.mrb[2].mxu1  ;;  %v365_v24 = vmul.f32 %v213_v18, %v213_v18  ;;  %v373_v53 = vmul.f32 %v245_v19, %v245_v19 }
  0xf8   :  { %330 = vst [vmem:[%s640_s2 + $0x18] sm:$0xff] %v466_v20  ;;  %v216_v22 = vpop.f32.mrb[3].mxu0  ;;  %338 = vst [vmem:[%s640_s2 + $0x58] sm:$0xff] %v474_v21  ;;  %v248_v23 = vpop.f32.mrb[3].mxu1  ;;  %v368_v30 = vmul.f32 %v466_v20, %v466_v20  ;;  %v376_v62 = vmul.f32 %v474_v21, %v474_v21 }
  0xf9   :  { %328 = vst [vmem:[%s640_s2 + $0x8] sm:$0xff] %v216_v22  ;;  %v343_v25 = vadd.f32 %v216_v22, %v213_v18  ;;  %v366_v26 = vmul.f32 %v216_v22, %v216_v22  ;;  %336 = vst [vmem:[%s640_s2 + $0x48] sm:$0xff] %v248_v23  ;;  %v374_v58 = vmul.f32 %v248_v23, %v248_v23 }
  0xfb   :  { %v344_v28 = vadd.f32 %v465_v16, %v343_v25  ;;  %v381_v29 = vadd.f32 %v366_v26, %v365_v24 }
  0xfd   :  { %v382_v31 = vadd.f32 %v381_v29, %v367_v27  ;;  %v469_v32 = vpop.f32.mrb[4].mxu0  ;;  %v345_v33 = vadd.f32 %v466_v20, %v344_v28  ;;  %v477_v34 = vpop.f32.mrb[4].mxu1 }
  0xfe   :  { %333 = vst [vmem:[%s640_s2 + $0x30] sm:$0xff] %v469_v32  ;;  %v229_v35 = vpop.f32.mrb[5].mxu0  ;;  %341 = vst [vmem:[%s640_s2 + $0x70] sm:$0xff] %v477_v34  ;;  %v261_v36 = vpop.f32.mrb[5].mxu1  ;;  %v371_v47 = vmul.f32 %v469_v32, %v469_v32  ;;  %v379_v7 = vmul.f32 %v477_v34, %v477_v34 }
  0xff   :  { %331 = vst [vmem:[%s640_s2 + $0x20] sm:$0xff] %v229_v35  ;;  %v346_v37 = vadd.f32 %v345_v33, %v229_v35  ;;  %v369_v38 = vmul.f32 %v229_v35, %v229_v35  ;;  %v383_v39 = vadd.f32 %v382_v31, %v368_v30  ;;  %v470_v40 = vpop.f32.mrb[6].mxu0  ;;  %339 = vst [vmem:[%s640_s2 + $0x60] sm:$0xff] %v261_v36  ;;  %v478_v41 = vpop.f32.mrb[6].mxu1 }
 0x100   :  { %334 = vst [vmem:[%s640_s2 + $0x38] sm:$0xff] %v470_v40  ;;  %v232_v42 = vpop.f32.mrb[7].mxu0  ;;  %342 = vst [vmem:[%s640_s2 + $0x78] sm:$0xff] %v478_v41  ;;  %v264_v43 = vpop.f32.mrb[7].mxu1  ;;  %v372_v50 = vmul.f32 %v470_v40, %v470_v40  ;;  %v377_v1 = vmul.f32 %v261_v36, %v261_v36  ;;  %v380_v10 = vmul.f32 %v478_v41, %v478_v41 }
 0x101   :  { %v384_v44 = vadd.f32 %v383_v39, %v369_v38  ;;  %332 = vst [vmem:[%s640_s2 + $0x28] sm:$0xff] %v232_v42  ;;  %v347_v45 = vadd.f32 %v346_v37, %v232_v42  ;;  %v370_v46 = vmul.f32 %v232_v42, %v232_v42  ;;  %340 = vst [vmem:[%s640_s2 + $0x68] sm:$0xff] %v264_v43 }
 0x102   :  { %v378_v6 = vmul.f32 %v264_v43, %v264_v43 }
 0x103   :  { %v348_v48 = vadd.f32 %v469_v32, %v347_v45  ;;  %v385_v49 = vadd.f32 %v384_v44, %v370_v46 }
 0x105   :  { %v386_v51 = vadd.f32 %v385_v49, %v371_v47  ;;  %v349_v52 = vadd.f32 %v470_v40, %v348_v48 }
 0x107   :  { %v350_v54 = vadd.f32 %v349_v52, %v245_v19  ;;  %v387_v55 = vadd.f32 %v386_v51, %v372_v50 }
 0x109   :  { %v388_v56 = vadd.f32 %v387_v55, %v373_v53  ;;  %v351_v57 = vadd.f32 %v350_v54, %v248_v23 }
 0x10b   :  { %v352_v60 = vadd.f32 %v473_v17, %v351_v57  ;;  %v389_v61 = vadd.f32 %v388_v56, %v374_v58 }
 0x10d   :  { %v390_v63 = vadd.f32 %v389_v61, %v375_v59  ;;  %v353_v0 = vadd.f32 %v474_v21, %v352_v60 }
 0x10f   :  { %v354_v2 = vadd.f32 %v353_v0, %v261_v36  ;;  %v391_v3 = vadd.f32 %v390_v63, %v376_v62 }
 0x111   :  { %v392_v4 = vadd.f32 %v391_v3, %v377_v1  ;;  %v355_v5 = vadd.f32 %v354_v2, %v264_v43 }
 0x113   :  { %v356_v8 = vadd.f32 %v477_v34, %v355_v5  ;;  %v393_v9 = vadd.f32 %v392_v4, %v378_v6 }
 0x115   :  { %v357_v11 = vadd.f32 %v478_v41, %v356_v8  ;;  %v394_v12 = vadd.f32 %v393_v9, %v379_v7 }
 0x117   :  { %v358_v13 = vrot.slane %v357_v11, 4  ;;  %v395_v14 = vadd.f32 %v394_v12, %v380_v10 }
 0x119   :  { %v359_v15 = vadd.f32 %v358_v13, %v357_v11  ;;  %v396_v16 = vrot.slane %v395_v14, 4 }
 0x11b   :  { %v360_v17 = vrot.slane %v359_v15, 2  ;;  %v397_v18 = vadd.f32 %v396_v16, %v395_v14 }
 0x11d   :  { %v361_v19 = vadd.f32 %v360_v17, %v359_v15  ;;  %v398_v20 = vrot.slane %v397_v18, 2 }
 0x11f   :  { %v362_v21 = vrot.slane %v361_v19, 1  ;;  %v399_v22 = vadd.f32 %v398_v20, %v397_v18 }
 0x121   :  { %v363_v23 = vadd.f32 %v362_v21, %v361_v19  ;;  %v400_v24 = vrot.slane %v399_v22, 1 }
 0x123   :  { %364 = vst [vmem:[%s641_s3] sm:$0xff] %v363_v23  ;;  %v401_v25 = vadd.f32 %v400_v24, %v399_v22 }
 0x125   :  { %402 = vst [vmem:[%s642_s4] sm:$0xff] %v401_v25 }

// kernel: basic_block_forward.9
= control target key start
LH: loop header
LB: loop body
LE: loop exit
PB: predicated region body
PF: predicated region fallthrough
CT: control target
= control target key end

     0   :  { %s466_s0 = inlined_call_operand.vmem [shape: f32[128,128], index: 0, kind: input, shape index: {}]   ;;  %s467_s1 = inlined_call_operand.vmem [shape: f32[1,128], index: 1, kind: input, shape index: {}]   ;;  %s468_s2 = inlined_call_operand.vmem [shape: f32[1,128], index: 2, kind: input, shape index: {}]   ;;  %s469_s3 = inlined_call_operand.vmem [shape: f32[128,128], index: 3, kind: input, shape index: {}]   ;;  %s470_s4 = inlined_call_operand.vmem [shape: f32[1,128], index: 4, kind: input, shape index: {}]   ;;  %s471_s5 = inlined_call_operand.vmem [shape: f32[1,128], index: 5, kind: input, shape index: {}]   ;;  %s472_s6 = inlined_call_operand.vmem [shape: f32[128,128], index: 6, kind: output, shape index: {}]  }
   0x1   :  { %v23_v0 = vld [vmem:[%s466_s0] sm:$0xff]  ;;  %v24_v8 = vld [vmem:[%s466_s0 + $0x8] sm:$0xff]  ;;  %v25_v10 = vld [vmem:[%s466_s0 + $0x10] sm:$0xff] }
   0x2   :  { %v244_v1 = vld [vmem:[%s467_s1] ss:$0 sm:$0xff]  ;;  %v86_v9 = vld [vmem:[%s469_s3 + $0x8] sm:$0xff]  ;;  %v87_v15 = vld [vmem:[%s469_s3 + $0x10] sm:$0xff] }
   0x3   :  { %v249_v2 = vld [vmem:[%s468_s2] ss:$0 sm:$0xff]  ;;  %v46_v3 = vmul.f32 %v244_v1, %v23_v0  ;;  %v47_v12 = vmul.f32 %v244_v1, %v24_v8  ;;  %v48_v14 = vmul.f32 %v244_v1, %v25_v10  ;;  %v26_v16 = vld [vmem:[%s466_s0 + $0x18] sm:$0xff]  ;;  %v28_v24 = vld [vmem:[%s466_s0 + $0x28] sm:$0xff] }
   0x4   :  { %v85_v4 = vld [vmem:[%s469_s3] sm:$0xff]  ;;  %v88_v17 = vld [vmem:[%s469_s3 + $0x18] sm:$0xff]  ;;  %v49_v20 = vmul.f32 %v244_v1, %v26_v16  ;;  %v90_v29 = vld [vmem:[%s469_s3 + $0x28] sm:$0xff]  ;;  %v51_v38 = vmul.f32 %v244_v1, %v28_v24 }
   0x5   :  { %v258_v5 = vld [vmem:[%s470_s4] ss:$0 sm:$0xff]  ;;  %v69_v11 = vadd.f32 %v249_v2, %v46_v3  ;;  %v70_v25 = vadd.f32 %v249_v2, %v47_v12  ;;  %v71_v27 = vadd.f32 %v249_v2, %v48_v14  ;;  %v29_v34 = vld [vmem:[%s466_s0 + $0x30] sm:$0xff]  ;;  %v30_v44 = vld [vmem:[%s466_s0 + $0x38] sm:$0xff] }
   0x6   :  { %v263_v6 = vld [vmem:[%s471_s5] ss:$0 sm:$0xff]  ;;  %v108_v7 = vmul.f32 %v258_v5, %v85_v4  ;;  %v109_v13 = vmul.f32 %v258_v5, %v86_v9  ;;  %v110_v19 = vmul.f32 %v258_v5, %v87_v15  ;;  %v111_v21 = vmul.f32 %v258_v5, %v88_v17  ;;  %v91_v39 = vld [vmem:[%s469_s3 + $0x30] sm:$0xff]  ;;  %v92_v45 = vld [vmem:[%s469_s3 + $0x38] sm:$0xff] }
   0x7   :  { %v27_v22 = vld [vmem:[%s466_s0 + $0x20] sm:$0xff]  ;;  %v72_v32 = vadd.f32 %v249_v2, %v49_v20  ;;  %v113_v43 = vmul.f32 %v258_v5, %v90_v29  ;;  %v74_v48 = vadd.f32 %v249_v2, %v51_v38  ;;  %v52_v49 = vmul.f32 %v244_v1, %v29_v34  ;;  %v32_v56 = vld [vmem:[%s466_s0 + $0x48] sm:$0xff]  ;;  %v33_v4 = vld [vmem:[%s466_s0 + $0x50] sm:$0xff] }
   0x8   :  { %v131_v18 = vadd.f32 %v263_v6, %v108_v7  ;;  %v89_v23 = vld [vmem:[%s469_s3 + $0x20] sm:$0xff]  ;;  %v132_v26 = vadd.f32 %v263_v6, %v109_v13  ;;  %v50_v28 = vmul.f32 %v244_v1, %v27_v22  ;;  %v133_v31 = vadd.f32 %v263_v6, %v110_v19  ;;  %v94_v3 = vld [vmem:[%s469_s3 + $0x48] sm:$0xff]  ;;  %v34_v12 = vld [vmem:[%s466_s0 + $0x58] sm:$0xff] }
   0x9   :  { %v134_v33 = vadd.f32 %v263_v6, %v111_v21  ;;  %v112_v37 = vmul.f32 %v258_v5, %v89_v23  ;;  %v31_v50 = vld [vmem:[%s466_s0 + $0x40] sm:$0xff]  ;;  %v136_v54 = vadd.f32 %v263_v6, %v113_v43  ;;  %v114_v55 = vmul.f32 %v258_v5, %v91_v39  ;;  %v96_v17 = vld [vmem:[%s469_s3 + $0x58] sm:$0xff]  ;;  %v37_v34 = vld [vmem:[%s466_s0 + $0x70] sm:$0xff] }
   0xa   :  { %v147_v30 = vadd.f32 %v131_v18, %v69_v11  ;;  %v148_v35 = vadd.f32 %v132_v26, %v70_v25  ;;  %v73_v36 = vadd.f32 %v249_v2, %v50_v28  ;;  %v149_v41 = vadd.f32 %v133_v31, %v71_v27  ;;  %v93_v51 = vld [vmem:[%s469_s3 + $0x40] sm:$0xff]  ;;  %v95_v11 = vld [vmem:[%s469_s3 + $0x50] sm:$0xff]  ;;  %v36_v28 = vld [vmem:[%s466_s0 + $0x68] sm:$0xff] }
   0xb   :  { %v150_v42 = vadd.f32 %v134_v33, %v72_v32  ;;  %v135_v47 = vadd.f32 %v263_v6, %v112_v37  ;;  %v75_v58 = vadd.f32 %v249_v2, %v52_v49  ;;  %v53_v59 = vmul.f32 %v244_v1, %v30_v44  ;;  %v35_v22 = vld [vmem:[%s466_s0 + $0x60] sm:$0xff]  ;;  %v98_v33 = vld [vmem:[%s469_s3 + $0x68] sm:$0xff]  ;;  %v99_v43 = vld [vmem:[%s469_s3 + $0x70] sm:$0xff] }
   0xc   :  { %v163_v40 = vmax.f32 %v147_v30, 0.0  ;;  %v164_v46 = vmax.f32 %v148_v35, 0.0  ;;  %v165_v52 = vmax.f32 %v149_v41, 0.0  ;;  %v115_v60 = vmul.f32 %v258_v5, %v92_v45  ;;  %v97_v27 = vld [vmem:[%s469_s3 + $0x60] sm:$0xff]  ;;  %v100_v49 = vld [vmem:[%s469_s3 + $0x78] sm:$0xff] }
   0xd   :  { %v166_v53 = vmax.f32 %v150_v42, 0.0  ;;  %v151_v57 = vadd.f32 %v135_v47, %v73_v36  ;;  %v152_v61 = vadd.f32 %v136_v54, %v74_v48  ;;  %v137_v62 = vadd.f32 %v263_v6, %v114_v55  ;;  %v38_v48 = vld [vmem:[%s466_s0 + $0x78] sm:$0xff] }
   0xe   :  { %179 = vst [vmem:[%s472_s6] sm:$0xff] %v163_v40  ;;  %180 = vst [vmem:[%s472_s6 + $0x8] sm:$0xff] %v164_v46  ;;  %v54_v63 = vmul.f32 %v244_v1, %v31_v50  ;;  %v116_v0 = vmul.f32 %v258_v5, %v93_v51  ;;  %v76_v8 = vadd.f32 %v249_v2, %v53_v59 }
   0xf   :  { %181 = vst [vmem:[%s472_s6 + $0x10] sm:$0xff] %v165_v52  ;;  %182 = vst [vmem:[%s472_s6 + $0x18] sm:$0xff] %v166_v53  ;;  %v167_v7 = vmax.f32 %v151_v57, 0.0  ;;  %v138_v9 = vadd.f32 %v263_v6, %v115_v60  ;;  %v55_v10 = vmul.f32 %v244_v1, %v32_v56  ;;  %v168_v13 = vmax.f32 %v152_v61, 0.0 }
  0x10   :  { %v153_v14 = vadd.f32 %v137_v62, %v75_v58  ;;  %v77_v15 = vadd.f32 %v249_v2, %v54_v63  ;;  %v139_v16 = vadd.f32 %v263_v6, %v116_v0  ;;  %v117_v20 = vmul.f32 %v258_v5, %v94_v3 }
  0x11   :  { %183 = vst [vmem:[%s472_s6 + $0x20] sm:$0xff] %v167_v7  ;;  %v154_v18 = vadd.f32 %v138_v9, %v76_v8  ;;  %v78_v19 = vadd.f32 %v249_v2, %v55_v10  ;;  %v56_v21 = vmul.f32 %v244_v1, %v33_v4  ;;  %184 = vst [vmem:[%s472_s6 + $0x28] sm:$0xff] %v168_v13 }
  0x12   :  { %v169_v23 = vmax.f32 %v153_v14, 0.0  ;;  %v155_v24 = vadd.f32 %v139_v16, %v77_v15  ;;  %v118_v25 = vmul.f32 %v258_v5, %v95_v11  ;;  %v57_v26 = vmul.f32 %v244_v1, %v34_v12 }
  0x13   :  { %v170_v29 = vmax.f32 %v154_v18, 0.0  ;;  %v140_v30 = vadd.f32 %v263_v6, %v117_v20  ;;  %v79_v31 = vadd.f32 %v249_v2, %v56_v21  ;;  %v119_v32 = vmul.f32 %v258_v5, %v96_v17 }
  0x14   :  { %185 = vst [vmem:[%s472_s6 + $0x30] sm:$0xff] %v169_v23  ;;  %v171_v35 = vmax.f32 %v155_v24, 0.0  ;;  %v141_v36 = vadd.f32 %v263_v6, %v118_v25  ;;  %v80_v37 = vadd.f32 %v249_v2, %v57_v26  ;;  %v58_v38 = vmul.f32 %v244_v1, %v35_v22 }
  0x15   :  { %186 = vst [vmem:[%s472_s6 + $0x38] sm:$0xff] %v170_v29  ;;  %v156_v39 = vadd.f32 %v140_v30, %v78_v19  ;;  %v142_v40 = vadd.f32 %v263_v6, %v119_v32  ;;  %v120_v41 = vmul.f32 %v258_v5, %v97_v27  ;;  %v59_v42 = vmul.f32 %v244_v1, %v36_v28 }
  0x16   :  { %187 = vst [vmem:[%s472_s6 + $0x40] sm:$0xff] %v171_v35  ;;  %v157_v44 = vadd.f32 %v141_v36, %v79_v31  ;;  %v81_v45 = vadd.f32 %v249_v2, %v58_v38  ;;  %v121_v46 = vmul.f32 %v258_v5, %v98_v33  ;;  %v60_v47 = vmul.f32 %v244_v1, %v37_v34 }
  0x17   :  { %v172_v50 = vmax.f32 %v156_v39, 0.0  ;;  %v158_v51 = vadd.f32 %v142_v40, %v80_v37  ;;  %v143_v52 = vadd.f32 %v263_v6, %v120_v41  ;;  %v82_v53 = vadd.f32 %v249_v2, %v59_v42 }
  0x18   :  { %v173_v54 = vmax.f32 %v157_v44, 0.0  ;;  %v144_v55 = vadd.f32 %v263_v6, %v121_v46  ;;  %v83_v56 = vadd.f32 %v249_v2, %v60_v47  ;;  %v122_v57 = vmul.f32 %v258_v5, %v99_v43 }
  0x19   :  { %188 = vst [vmem:[%s472_s6 + $0x48] sm:$0xff] %v172_v50  ;;  %v174_v58 = vmax.f32 %v158_v51, 0.0  ;;  %v159_v59 = vadd.f32 %v143_v52, %v81_v45  ;;  %v61_v60 = vmul.f32 %v244_v1, %v38_v48  ;;  %v123_v61 = vmul.f32 %v258_v5, %v100_v49 }
  0x1a   :  { %189 = vst [vmem:[%s472_s6 + $0x50] sm:$0xff] %v173_v54  ;;  %v160_v62 = vadd.f32 %v144_v55, %v82_v53  ;;  %v145_v63 = vadd.f32 %v263_v6, %v122_v57 }
  0x1b   :  { %190 = vst [vmem:[%s472_s6 + $0x58] sm:$0xff] %v174_v58  ;;  %v175_v0 = vmax.f32 %v159_v59, 0.0  ;;  %v84_v3 = vadd.f32 %v249_v2, %v61_v60  ;;  %v146_v4 = vadd.f32 %v263_v6, %v123_v61 }
  0x1c   :  { %v176_v7 = vmax.f32 %v160_v62, 0.0  ;;  %v161_v1 = vadd.f32 %v145_v63, %v83_v56 }
  0x1d   :  { %191 = vst [vmem:[%s472_s6 + $0x60] sm:$0xff] %v175_v0  ;;  %v162_v5 = vadd.f32 %v146_v4, %v84_v3 }
  0x1e   :  { %192 = vst [vmem:[%s472_s6 + $0x68] sm:$0xff] %v176_v7  ;;  %v177_v8 = vmax.f32 %v161_v1, 0.0 }
  0x1f   :  { %v178_v9 = vmax.f32 %v162_v5, 0.0 }
  0x20   :  { %193 = vst [vmem:[%s472_s6 + $0x70] sm:$0xff] %v177_v8 }
  0x21   :  { %194 = vst [vmem:[%s472_s6 + $0x78] sm:$0xff] %v178_v9 }

</bundles_post_ra>
